<compile_context>
chip_gen: v5e
topology: v5e:2x2
jax: 0.10.0
libtpu: 0.0.40
codegen_flags: <defaults>
</compile_context>

<pallas_src>
import jax
import jax.numpy as jnp
from jax.experimental import pallas as pl
from jax.experimental.pallas import tpu as pltpu

IN_FEATURES = 28 * 28            # 784
DIMS = [IN_FEATURES, 128, 64, 12, 6, 12, 64, 128, IN_FEATURES]

# Above the v5e (16 MiB) / v6e,v7x (32 MiB) scoped defaults, comfortably below
# v7x's 64 MiB physical VMEM for TB <= 1024.
_VMEM_LIMIT_BYTES = 48 * 1024 * 1024
_MAX_TB = 1024


def _round_up(x, m):
    return -(-x // m) * m


def _autoencoder_kernel(x_ref,
                        w1, b1, w2, b2, w3, b3, w45, b45,
                        w6, b6, w7, b7, w8, b8,
                        o_ref):
    def linear(h, w_ref, b_ref):
        return jnp.dot(h, w_ref[...],
                       preferred_element_type=jnp.float32) + b_ref[...]

    x = x_ref[...]

    # ----- encoder -----
    # Big layer on the MXU in bf16 (f32 accumulate): ~3x fewer vmatmul passes.
    h = jnp.maximum(linear(x.astype(jnp.bfloat16), w1, b1), 0.0)   # 784 -> 128
    h = jnp.maximum(linear(h, w2, b2), 0.0)                        # 128 -> 64
    h = jnp.maximum(linear(h, w3, b3), 0.0)                        # 64  -> 12
    # fused bottleneck: (12 -> 6, no activation) then (6 -> 12), ReLU after
    h = jnp.maximum(linear(h, w45, b45), 0.0)                      # 12 -> 12
    # ----- decoder -----
    h = jnp.maximum(linear(h, w6, b6), 0.0)                        # 12  -> 64
    h = jnp.maximum(linear(h, w7, b7), 0.0)                        # 64  -> 128
    z = linear(h.astype(jnp.bfloat16), w8, b8)                     # 128 -> 784

    # Numerically stable sigmoid; exp argument is always <= 0.  Single EUP
    # approx-reciprocal + one VPU multiply instead of two divides per element.
    zn = jnp.where(z >= 0.0, -z, z)
    e = jnp.exp(zn)
    r = pl.reciprocal(1.0 + e, approx=True)
    o_ref[...] = jnp.where(z >= 0.0, r, e * r)


def _prepare_params(params):
    """Fuse the 12->6->12 bottleneck; cast the two big weight matrices to bf16."""
    ((w1, b1), (w2, b2), (w3, b3), (w4, b4),
     (w5, b5), (w6, b6), (w7, b7), (w8, b8)) = params
    # Exact algebraic fusion (no activation between layers 4 and 5).
    w45 = w4 @ w5                      # (12, 12)
    b45 = b4 @ w5 + b5                 # (1, 12)
    return [(w1.astype(jnp.bfloat16), b1), (w2, b2), (w3, b3), (w45, b45),
            (w6, b6), (w7, b7), (w8.astype(jnp.bfloat16), b8)]


def _choose_tile(B, block_b):
    """Balanced batch tile (multiple of 8), capped for VMEM headroom.

    When B is large enough, force >= 2 grid steps so the "parallel" batch
    axis can be sharded across v7x's two TensorCores (no effect on v5e/v6e).
    """
    block_b = min(block_b, _MAX_TB)
    n_tiles = pl.cdiv(B, block_b)
    if B >= 16 and n_tiles < 2:
        n_tiles = 2
    return min(_round_up(pl.cdiv(B, n_tiles), 8), _MAX_TB)


def autoencoder_forward(x, params, *, block_b=1024):
    """x: (B, 784) f32.  params: 8 (W (in,out), b (1,out)) pairs (unfused)."""
    B, F = x.shape
    assert F == IN_FEATURES
    TB = _choose_tile(B, block_b)
    grid = (pl.cdiv(B, TB),)   # ragged last block handled by boundary masking

    fused = _prepare_params(params)
    flat = []
    # Feature dim kept at 784 (== full array dim): no pad/slice HBM pass.
    in_specs = [pl.BlockSpec((TB, IN_FEATURES), lambda i: (i, 0))]
    for w, b in fused:
        flat.append(w)
        flat.append(b)
        # Whole weight/bias resident in VMEM; constant index_map -> no re-DMA.
        in_specs.append(pl.BlockSpec(w.shape, lambda i: (0, 0)))
        in_specs.append(pl.BlockSpec(b.shape, lambda i: (0, 0)))

    return pl.pallas_call(
        _autoencoder_kernel,
        out_shape=jax.ShapeDtypeStruct((B, IN_FEATURES), jnp.float32),
        grid=grid,
        in_specs=in_specs,
        out_specs=pl.BlockSpec((TB, IN_FEATURES), lambda i: (i, 0)),
        compiler_params=pltpu.CompilerParams(
            dimension_semantics=("parallel",),
            vmem_limit_bytes=_VMEM_LIMIT_BYTES),
    )(x, *flat)


def init_params(key):
    """Deterministic init matching the nn.Linear shapes (stored as (in, out))."""
    params = []
    for i in range(len(DIMS) - 1):
        fan_in, fan_out = DIMS[i], DIMS[i + 1]
        key, kw, kb = jax.random.split(key, 3)
        bound = 1.0 / jnp.sqrt(jnp.float32(fan_in))
        w = jax.random.uniform(kw, (fan_in, fan_out), jnp.float32, -bound, bound)
        b = jax.random.uniform(kb, (1, fan_out), jnp.float32, -bound, bound)
        params.append((w, b))
    return params


def reference_forward(x, params):
    """Pure-JAX f32 reference matching the unfused PyTorch module exactly."""
    h = x
    n = len(params)
    for i, (w, b) in enumerate(params):
        h = h @ w + b
        if i == n - 1:
            h = jax.nn.sigmoid(h)
        elif i != 3:        # layer index 3 (12 -> 6 bottleneck) has no activation
            h = jnp.maximum(h, 0.0)
    return h


if __name__ == "__main__":
    key = jax.random.PRNGKey(0)
    key, kx = jax.random.split(key)

    B = 8
    x = jax.random.uniform(kx, (B, IN_FEATURES), jnp.float32)  # MNIST-like flat input
    params = init_params(key)

    out = autoencoder_forward(x, params)
    out = jax.block_until_ready(out)

    ref = reference_forward(x, params)
    assert out.shape == (B, IN_FEATURES)
    # Tolerance accounts for the bf16 MXU operands on the two 784-wide layers,
    # the approx EUP reciprocal in the sigmoid, and the exact-but-reassociated
    # bottleneck fusion (all per the performance review).
    assert jnp.allclose(out, ref, atol=1e-2, rtol=1e-2), "mismatch vs reference"

    print("KERNEL_OK")
</pallas_src>

<mosaic_0001>
module attributes {stable_mosaic.version = 11 : i64} {
  func.func @_autoencoder_kernel(%arg0: i32, %arg1: memref<8x784xf32, #tpu.memory_space<vmem>>, %arg2: memref<784x128xbf16, #tpu.memory_space<vmem>>, %arg3: memref<1x128xf32, #tpu.memory_space<vmem>>, %arg4: memref<128x64xf32, #tpu.memory_space<vmem>>, %arg5: memref<1x64xf32, #tpu.memory_space<vmem>>, %arg6: memref<64x12xf32, #tpu.memory_space<vmem>>, %arg7: memref<1x12xf32, #tpu.memory_space<vmem>>, %arg8: memref<12x12xf32, #tpu.memory_space<vmem>>, %arg9: memref<1x12xf32, #tpu.memory_space<vmem>>, %arg10: memref<12x64xf32, #tpu.memory_space<vmem>>, %arg11: memref<1x64xf32, #tpu.memory_space<vmem>>, %arg12: memref<64x128xf32, #tpu.memory_space<vmem>>, %arg13: memref<1x128xf32, #tpu.memory_space<vmem>>, %arg14: memref<128x784xbf16, #tpu.memory_space<vmem>>, %arg15: memref<1x784xf32, #tpu.memory_space<vmem>>, %arg16: memref<8x784xf32, #tpu.memory_space<vmem>>) attributes {dimension_semantics = [#tpu.dimension_semantics<parallel>], iteration_bounds = array<i64: 1>, scalar_prefetch = 0 : i64, scratch_operands = 0 : i64, tpu.core_type = #tpu.core_type<tc>, window_params = [{transform_indices = @transform_0, window_bounds = array<i64: 8, 784>}, {pipeline_mode = #tpu.pipeline_mode<synchronous>, transform_indices = @transform_1, window_bounds = array<i64: 784, 128>}, {pipeline_mode = #tpu.pipeline_mode<synchronous>, transform_indices = @transform_2, window_bounds = array<i64: 1, 128>}, {pipeline_mode = #tpu.pipeline_mode<synchronous>, transform_indices = @transform_3, window_bounds = array<i64: 128, 64>}, {pipeline_mode = #tpu.pipeline_mode<synchronous>, transform_indices = @transform_4, window_bounds = array<i64: 1, 64>}, {pipeline_mode = #tpu.pipeline_mode<synchronous>, transform_indices = @transform_5, window_bounds = array<i64: 64, 12>}, {pipeline_mode = #tpu.pipeline_mode<synchronous>, transform_indices = @transform_6, window_bounds = array<i64: 1, 12>}, {pipeline_mode = #tpu.pipeline_mode<synchronous>, transform_indices = @transform_7, window_bounds = array<i64: 12, 12>}, {pipeline_mode = #tpu.pipeline_mode<synchronous>, transform_indices = @transform_8, window_bounds = array<i64: 1, 12>}, {pipeline_mode = #tpu.pipeline_mode<synchronous>, transform_indices = @transform_9, window_bounds = array<i64: 12, 64>}, {pipeline_mode = #tpu.pipeline_mode<synchronous>, transform_indices = @transform_10, window_bounds = array<i64: 1, 64>}, {pipeline_mode = #tpu.pipeline_mode<synchronous>, transform_indices = @transform_11, window_bounds = array<i64: 64, 128>}, {pipeline_mode = #tpu.pipeline_mode<synchronous>, transform_indices = @transform_12, window_bounds = array<i64: 1, 128>}, {pipeline_mode = #tpu.pipeline_mode<synchronous>, transform_indices = @transform_13, window_bounds = array<i64: 128, 784>}, {pipeline_mode = #tpu.pipeline_mode<synchronous>, transform_indices = @transform_14, window_bounds = array<i64: 1, 784>}, {transform_indices = @transform_15, window_bounds = array<i64: 8, 784>}]} {
    %c0 = arith.constant 0 : index
    %c0_0 = arith.constant 0 : index
    %0 = vector.load %arg1[%c0, %c0_0] : memref<8x784xf32, #tpu.memory_space<vmem>>, vector<8x784xf32>
    %1 = arith.truncf %0 : vector<8x784xf32> to vector<8x784xbf16>
    %c0_1 = arith.constant 0 : index
    %c0_2 = arith.constant 0 : index
    %2 = vector.load %arg2[%c0_1, %c0_2] : memref<784x128xbf16, #tpu.memory_space<vmem>>, vector<784x128xbf16>
    %cst = arith.constant dense<0.000000e+00> : vector<8x128xf32>
    %3 = tpu.matmul %1, %2, %cst {dimension_numbers = #tpu.dot_dimension_numbers<[1], [0], [0], [1], [0, 0, 1, 1], [], []>} : vector<8x784xbf16>, vector<784x128xbf16>, vector<8x128xf32> -> vector<8x128xf32>
    %c0_3 = arith.constant 0 : index
    %c0_4 = arith.constant 0 : index
    %4 = vector.load %arg3[%c0_3, %c0_4] : memref<1x128xf32, #tpu.memory_space<vmem>>, vector<1x128xf32>
    %5 = vector.broadcast %4 : vector<1x128xf32> to vector<8x128xf32>
    %6 = arith.addf %3, %5 : vector<8x128xf32>
    %cst_5 = arith.constant 0.000000e+00 : f32
    %7 = vector.broadcast %cst_5 : f32 to vector<8x128xf32>
    %8 = arith.maximumf %6, %7 : vector<8x128xf32>
    %c0_6 = arith.constant 0 : index
    %c0_7 = arith.constant 0 : index
    %9 = vector.load %arg4[%c0_6, %c0_7] : memref<128x64xf32, #tpu.memory_space<vmem>>, vector<128x64xf32>
    %cst_8 = arith.constant dense<0.000000e+00> : vector<8x64xf32>
    %10 = tpu.matmul %8, %9, %cst_8 {dimension_numbers = #tpu.dot_dimension_numbers<[1], [0], [0], [1], [0, 0, 1, 1], [], []>} : vector<8x128xf32>, vector<128x64xf32>, vector<8x64xf32> -> vector<8x64xf32>
    %c0_9 = arith.constant 0 : index
    %c0_10 = arith.constant 0 : index
    %11 = vector.load %arg5[%c0_9, %c0_10] : memref<1x64xf32, #tpu.memory_space<vmem>>, vector<1x64xf32>
    %12 = vector.broadcast %11 : vector<1x64xf32> to vector<8x64xf32>
    %13 = arith.addf %10, %12 : vector<8x64xf32>
    %cst_11 = arith.constant 0.000000e+00 : f32
    %14 = vector.broadcast %cst_11 : f32 to vector<8x64xf32>
    %15 = arith.maximumf %13, %14 : vector<8x64xf32>
    %c0_12 = arith.constant 0 : index
    %c0_13 = arith.constant 0 : index
    %16 = vector.load %arg6[%c0_12, %c0_13] : memref<64x12xf32, #tpu.memory_space<vmem>>, vector<64x12xf32>
    %cst_14 = arith.constant dense<0.000000e+00> : vector<8x12xf32>
    %17 = tpu.matmul %15, %16, %cst_14 {dimension_numbers = #tpu.dot_dimension_numbers<[1], [0], [0], [1], [0, 0, 1, 1], [], []>} : vector<8x64xf32>, vector<64x12xf32>, vector<8x12xf32> -> vector<8x12xf32>
    %c0_15 = arith.constant 0 : index
    %c0_16 = arith.constant 0 : index
    %18 = vector.load %arg7[%c0_15, %c0_16] : memref<1x12xf32, #tpu.memory_space<vmem>>, vector<1x12xf32>
    %19 = vector.broadcast %18 : vector<1x12xf32> to vector<8x12xf32>
    %20 = arith.addf %17, %19 : vector<8x12xf32>
    %cst_17 = arith.constant 0.000000e+00 : f32
    %21 = vector.broadcast %cst_17 : f32 to vector<8x12xf32>
    %22 = arith.maximumf %20, %21 : vector<8x12xf32>
    %c0_18 = arith.constant 0 : index
    %c0_19 = arith.constant 0 : index
    %23 = vector.load %arg8[%c0_18, %c0_19] : memref<12x12xf32, #tpu.memory_space<vmem>>, vector<12x12xf32>
    %cst_20 = arith.constant dense<0.000000e+00> : vector<8x12xf32>
    %24 = tpu.matmul %22, %23, %cst_20 {dimension_numbers = #tpu.dot_dimension_numbers<[1], [0], [0], [1], [0, 0, 1, 1], [], []>} : vector<8x12xf32>, vector<12x12xf32>, vector<8x12xf32> -> vector<8x12xf32>
    %c0_21 = arith.constant 0 : index
    %c0_22 = arith.constant 0 : index
    %25 = vector.load %arg9[%c0_21, %c0_22] : memref<1x12xf32, #tpu.memory_space<vmem>>, vector<1x12xf32>
    %26 = vector.broadcast %25 : vector<1x12xf32> to vector<8x12xf32>
    %27 = arith.addf %24, %26 : vector<8x12xf32>
    %cst_23 = arith.constant 0.000000e+00 : f32
    %28 = vector.broadcast %cst_23 : f32 to vector<8x12xf32>
    %29 = arith.maximumf %27, %28 : vector<8x12xf32>
    %c0_24 = arith.constant 0 : index
    %c0_25 = arith.constant 0 : index
    %30 = vector.load %arg10[%c0_24, %c0_25] : memref<12x64xf32, #tpu.memory_space<vmem>>, vector<12x64xf32>
    %cst_26 = arith.constant dense<0.000000e+00> : vector<8x64xf32>
    %31 = tpu.matmul %29, %30, %cst_26 {dimension_numbers = #tpu.dot_dimension_numbers<[1], [0], [0], [1], [0, 0, 1, 1], [], []>} : vector<8x12xf32>, vector<12x64xf32>, vector<8x64xf32> -> vector<8x64xf32>
    %c0_27 = arith.constant 0 : index
    %c0_28 = arith.constant 0 : index
    %32 = vector.load %arg11[%c0_27, %c0_28] : memref<1x64xf32, #tpu.memory_space<vmem>>, vector<1x64xf32>
    %33 = vector.broadcast %32 : vector<1x64xf32> to vector<8x64xf32>
    %34 = arith.addf %31, %33 : vector<8x64xf32>
    %cst_29 = arith.constant 0.000000e+00 : f32
    %35 = vector.broadcast %cst_29 : f32 to vector<8x64xf32>
    %36 = arith.maximumf %34, %35 : vector<8x64xf32>
    %c0_30 = arith.constant 0 : index
    %c0_31 = arith.constant 0 : index
    %37 = vector.load %arg12[%c0_30, %c0_31] : memref<64x128xf32, #tpu.memory_space<vmem>>, vector<64x128xf32>
    %cst_32 = arith.constant dense<0.000000e+00> : vector<8x128xf32>
    %38 = tpu.matmul %36, %37, %cst_32 {dimension_numbers = #tpu.dot_dimension_numbers<[1], [0], [0], [1], [0, 0, 1, 1], [], []>} : vector<8x64xf32>, vector<64x128xf32>, vector<8x128xf32> -> vector<8x128xf32>
    %c0_33 = arith.constant 0 : index
    %c0_34 = arith.constant 0 : index
    %39 = vector.load %arg13[%c0_33, %c0_34] : memref<1x128xf32, #tpu.memory_space<vmem>>, vector<1x128xf32>
    %40 = vector.broadcast %39 : vector<1x128xf32> to vector<8x128xf32>
    %41 = arith.addf %38, %40 : vector<8x128xf32>
    %cst_35 = arith.constant 0.000000e+00 : f32
    %42 = vector.broadcast %cst_35 : f32 to vector<8x128xf32>
    %43 = arith.maximumf %41, %42 : vector<8x128xf32>
    %44 = arith.truncf %43 : vector<8x128xf32> to vector<8x128xbf16>
    %c0_36 = arith.constant 0 : index
    %c0_37 = arith.constant 0 : index
    %45 = vector.load %arg14[%c0_36, %c0_37] : memref<128x784xbf16, #tpu.memory_space<vmem>>, vector<128x784xbf16>
    %cst_38 = arith.constant dense<0.000000e+00> : vector<8x784xf32>
    %46 = tpu.matmul %44, %45, %cst_38 {dimension_numbers = #tpu.dot_dimension_numbers<[1], [0], [0], [1], [0, 0, 1, 1], [], []>} : vector<8x128xbf16>, vector<128x784xbf16>, vector<8x784xf32> -> vector<8x784xf32>
    %c0_39 = arith.constant 0 : index
    %c0_40 = arith.constant 0 : index
    %47 = vector.load %arg15[%c0_39, %c0_40] : memref<1x784xf32, #tpu.memory_space<vmem>>, vector<1x784xf32>
    %48 = vector.broadcast %47 : vector<1x784xf32> to vector<8x784xf32>
    %49 = arith.addf %46, %48 : vector<8x784xf32>
    %cst_41 = arith.constant 0.000000e+00 : f32
    %50 = vector.broadcast %cst_41 : f32 to vector<8x784xf32>
    %51 = arith.cmpf oge, %49, %50 : vector<8x784xf32>
    %cst_42 = arith.constant 0.000000e+00 : f32
    %52 = vector.broadcast %cst_42 : f32 to vector<8x784xf32>
    %53 = arith.subf %52, %49 : vector<8x784xf32>
    %54 = arith.select %51, %53, %49 : vector<8x784xi1>, vector<8x784xf32>
    %55 = math.exp %54 : vector<8x784xf32>
    %cst_43 = arith.constant 1.000000e+00 : f32
    %56 = vector.broadcast %cst_43 : f32 to vector<8x784xf32>
    %57 = arith.addf %56, %55 : vector<8x784xf32>
    %58 = tpu.reciprocal %57 {approx = true} : vector<8x784xf32> -> vector<8x784xf32>
    %cst_44 = arith.constant 0.000000e+00 : f32
    %59 = vector.broadcast %cst_44 : f32 to vector<8x784xf32>
    %60 = arith.cmpf oge, %49, %59 : vector<8x784xf32>
    %61 = arith.mulf %55, %58 : vector<8x784xf32>
    %62 = arith.select %60, %58, %61 : vector<8x784xi1>, vector<8x784xf32>
    %c0_45 = arith.constant 0 : index
    %c0_46 = arith.constant 0 : index
    %63 = vector.load %arg16[%c0_45, %c0_46] : memref<8x784xf32, #tpu.memory_space<vmem>>, vector<8x784xf32>
    tpu.vector_store %arg16[%c0_45, %c0_46], %62 {strides = array<i32>} : memref<8x784xf32, #tpu.memory_space<vmem>>, vector<8x784xf32>,
    return
  }
  func.func @transform_0(%arg0: i32) -> (i32, i32) {
    %c0_i32 = arith.constant 0 : i32
    %c0_i32_0 = arith.constant 0 : i32
    return %arg0, %c0_i32 : i32, i32
  }
  func.func @transform_1(%arg0: i32) -> (i32, i32) {
    %c0_i32 = arith.constant 0 : i32
    %c0_i32_0 = arith.constant 0 : i32
    %c0_i32_1 = arith.constant 0 : i32
    return %c0_i32, %c0_i32_0 : i32, i32
  }
  func.func @transform_2(%arg0: i32) -> (i32, i32) {
    %c0_i32 = arith.constant 0 : i32
    %c0_i32_0 = arith.constant 0 : i32
    %c0_i32_1 = arith.constant 0 : i32
    return %c0_i32, %c0_i32_0 : i32, i32
  }
  func.func @transform_3(%arg0: i32) -> (i32, i32) {
    %c0_i32 = arith.constant 0 : i32
    %c0_i32_0 = arith.constant 0 : i32
    %c0_i32_1 = arith.constant 0 : i32
    return %c0_i32, %c0_i32_0 : i32, i32
  }
  func.func @transform_4(%arg0: i32) -> (i32, i32) {
    %c0_i32 = arith.constant 0 : i32
    %c0_i32_0 = arith.constant 0 : i32
    %c0_i32_1 = arith.constant 0 : i32
    return %c0_i32, %c0_i32_0 : i32, i32
  }
  func.func @transform_5(%arg0: i32) -> (i32, i32) {
    %c0_i32 = arith.constant 0 : i32
    %c0_i32_0 = arith.constant 0 : i32
    %c0_i32_1 = arith.constant 0 : i32
    return %c0_i32, %c0_i32_0 : i32, i32
  }
  func.func @transform_6(%arg0: i32) -> (i32, i32) {
    %c0_i32 = arith.constant 0 : i32
    %c0_i32_0 = arith.constant 0 : i32
    %c0_i32_1 = arith.constant 0 : i32
    return %c0_i32, %c0_i32_0 : i32, i32
  }
  func.func @transform_7(%arg0: i32) -> (i32, i32) {
    %c0_i32 = arith.constant 0 : i32
    %c0_i32_0 = arith.constant 0 : i32
    %c0_i32_1 = arith.constant 0 : i32
    return %c0_i32, %c0_i32_0 : i32, i32
  }
  func.func @transform_8(%arg0: i32) -> (i32, i32) {
    %c0_i32 = arith.constant 0 : i32
    %c0_i32_0 = arith.constant 0 : i32
    %c0_i32_1 = arith.constant 0 : i32
    return %c0_i32, %c0_i32_0 : i32, i32
  }
  func.func @transform_9(%arg0: i32) -> (i32, i32) {
    %c0_i32 = arith.constant 0 : i32
    %c0_i32_0 = arith.constant 0 : i32
    %c0_i32_1 = arith.constant 0 : i32
    return %c0_i32, %c0_i32_0 : i32, i32
  }
  func.func @transform_10(%arg0: i32) -> (i32, i32) {
    %c0_i32 = arith.constant 0 : i32
    %c0_i32_0 = arith.constant 0 : i32
    %c0_i32_1 = arith.constant 0 : i32
    return %c0_i32, %c0_i32_0 : i32, i32
  }
  func.func @transform_11(%arg0: i32) -> (i32, i32) {
    %c0_i32 = arith.constant 0 : i32
    %c0_i32_0 = arith.constant 0 : i32
    %c0_i32_1 = arith.constant 0 : i32
    return %c0_i32, %c0_i32_0 : i32, i32
  }
  func.func @transform_12(%arg0: i32) -> (i32, i32) {
    %c0_i32 = arith.constant 0 : i32
    %c0_i32_0 = arith.constant 0 : i32
    %c0_i32_1 = arith.constant 0 : i32
    return %c0_i32, %c0_i32_0 : i32, i32
  }
  func.func @transform_13(%arg0: i32) -> (i32, i32) {
    %c0_i32 = arith.constant 0 : i32
    %c0_i32_0 = arith.constant 0 : i32
    %c0_i32_1 = arith.constant 0 : i32
    return %c0_i32, %c0_i32_0 : i32, i32
  }
  func.func @transform_14(%arg0: i32) -> (i32, i32) {
    %c0_i32 = arith.constant 0 : i32
    %c0_i32_0 = arith.constant 0 : i32
    %c0_i32_1 = arith.constant 0 : i32
    return %c0_i32, %c0_i32_0 : i32, i32
  }
  func.func @transform_15(%arg0: i32) -> (i32, i32) {
    %c0_i32 = arith.constant 0 : i32
    %c0_i32_0 = arith.constant 0 : i32
    return %arg0, %c0_i32 : i32, i32
  }
}

</mosaic_0001>

<bundles_post_ra>
// kernel: tpu_custom_call.1
= control target key start
LH: loop header
LB: loop body
LE: loop exit
PB: predicated region body
PF: predicated region fallthrough
CT: control target
= control target key end

     0   :  { %s2653_s0 = inlined_call_operand.vmem [shape: f32[8,784], index: 0, kind: input, shape index: {}]   ;;  %s2654_s1 = inlined_call_operand.vmem [shape: bf16[784,128], index: 1, kind: input, shape index: {}]   ;;  %s2655_s2 = inlined_call_operand.vmem [shape: f32[1,128], index: 2, kind: input, shape index: {}]   ;;  %s2656_s3 = inlined_call_operand.vmem [shape: f32[128,64], index: 3, kind: input, shape index: {}]   ;;  %s2657_s4 = inlined_call_operand.vmem [shape: f32[1,64], index: 4, kind: input, shape index: {}]   ;;  %s2658_s5 = inlined_call_operand.vmem [shape: f32[64,12], index: 5, kind: input, shape index: {}]   ;;  %s2659_s6 = inlined_call_operand.vmem [shape: f32[1,12], index: 6, kind: input, shape index: {}]   ;;  %s2660_s7 = inlined_call_operand.vmem [shape: f32[12,12], index: 7, kind: input, shape index: {}]   ;;  %s2661_s8 = inlined_call_operand.vmem [shape: f32[1,12], index: 8, kind: input, shape index: {}]   ;;  %s2662_s9 = inlined_call_operand.vmem [shape: f32[12,64], index: 9, kind: input, shape index: {}]   ;;  %s2663_s10 = inlined_call_operand.vmem [shape: f32[1,64], index: 10, kind: input, shape index: {}]   ;;  %s2664_s11 = inlined_call_operand.vmem [shape: f32[64,128], index: 11, kind: input, shape index: {}]   ;;  %s2665_s12 = inlined_call_operand.vmem [shape: f32[1,128], index: 12, kind: input, shape index: {}]   ;;  %s2666_s13 = inlined_call_operand.vmem [shape: bf16[128,784], index: 13, kind: input, shape index: {}]   ;;  %s2667_s14 = inlined_call_operand.vmem [shape: f32[1,784], index: 14, kind: input, shape index: {}]   ;;  %s2668_s15 = inlined_call_operand.hbm [shape: f32[8,784], index: 15, kind: output, shape index: {}]  }
   0x1   :  { %v1720_v0 = vld [vmem:[%s2654_s1 + $0x38] sm:$0xff]  ;;  %v1719_v2 = vld [vmem:[%s2654_s1 + $0x30] sm:$0xff]  ;;  %v1718_v8 = vld [vmem:[%s2654_s1 + $0x28] sm:$0xff] }
   0x2   :  { %v1728_v1 = vld [vmem:[%s2654_s1 + $0x78] sm:$0xff]  ;;  %466 = vmatpush.bf16.msra.mxu0 %v1720_v0  ;;  %v1727_v3 = vld [vmem:[%s2654_s1 + $0x70] sm:$0xff]  ;;  %v1726_v9 = vld [vmem:[%s2654_s1 + $0x68] sm:$0xff] }
   0x3   :  { %479 = vmatpush.bf16.msra.mxu1 %v1728_v1  ;;  %v1736_v4 = vld [vmem:[%s2654_s1 + $0xb8] sm:$0xff]  ;;  %v1735_v6 = vld [vmem:[%s2654_s1 + $0xb0] sm:$0xff]  ;;  %v1734_v10 = vld [vmem:[%s2654_s1 + $0xa8] sm:$0xff] }
   0x4   :  { %v1744_v5 = vld [vmem:[%s2654_s1 + $0xf8] sm:$0xff]  ;;  %492 = vmatpush.bf16.msra.mxu2 %v1736_v4  ;;  %v1743_v7 = vld [vmem:[%s2654_s1 + $0xf0] sm:$0xff]  ;;  %v1742_v11 = vld [vmem:[%s2654_s1 + $0xe8] sm:$0xff] }
   0x5   :  { %505 = vmatpush.bf16.msra.mxu3 %v1744_v5  ;;  %v1717_v12 = vld [vmem:[%s2654_s1 + $0x20] sm:$0xff]  ;;  %v1716_v16 = vld [vmem:[%s2654_s1 + $0x18] sm:$0xff] }
   0x6   :  { %467 = vmatpush.bf16.msra.mxu0 %v1719_v2  ;;  %v1725_v13 = vld [vmem:[%s2654_s1 + $0x60] sm:$0xff]  ;;  %v1724_v17 = vld [vmem:[%s2654_s1 + $0x58] sm:$0xff] }
   0x7   :  { %480 = vmatpush.bf16.msra.mxu1 %v1727_v3  ;;  %v1733_v14 = vld [vmem:[%s2654_s1 + $0xa0] sm:$0xff]  ;;  %v1732_v18 = vld [vmem:[%s2654_s1 + $0x98] sm:$0xff] }
   0x8   :  { %493 = vmatpush.bf16.msra.mxu2 %v1735_v6  ;;  %v1741_v15 = vld [vmem:[%s2654_s1 + $0xe0] sm:$0xff]  ;;  %v1740_v19 = vld [vmem:[%s2654_s1 + $0xd8] sm:$0xff] }
   0x9   :  { %506 = vmatpush.bf16.msra.mxu3 %v1743_v7 }
   0xa   :  { %468 = vmatpush.bf16.msra.mxu0 %v1718_v8 }
   0xb   :  { %481 = vmatpush.bf16.msra.mxu1 %v1726_v9 }
   0xc   :  { %494 = vmatpush.bf16.msra.mxu2 %v1734_v10 }
   0xd   :  { %507 = vmatpush.bf16.msra.mxu3 %v1742_v11 }
   0xe   :  { %469 = vmatpush.bf16.msra.mxu0 %v1717_v12 }
   0xf   :  { %482 = vmatpush.bf16.msra.mxu1 %v1725_v13 }
  0x10   :  { %495 = vmatpush.bf16.msra.mxu2 %v1733_v14 }
  0x11   :  { %508 = vmatpush.bf16.msra.mxu3 %v1741_v15 }
  0x12   :  { %20 = vsyncpa [#allocation3], 0  ;;  %470 = vmatpush.bf16.msra.mxu0 %v1716_v16  ;;  %v1715_v20 = vld [vmem:[%s2654_s1 + $0x10] sm:$0xff]  ;;  %v1714_v24 = vld [vmem:[%s2654_s1 + $0x8] sm:$0xff]  ;;  %vm462_vm0 = vcmask 130048   ;;  %vm646_vm1 = vcmask 1043456  }
  0x13   :  { %483 = vmatpush.bf16.msra.mxu1 %v1724_v17  ;;  %v1723_v21 = vld [vmem:[%s2654_s1 + $0x50] sm:$0xff]  ;;  %v1722_v25 = vld [vmem:[%s2654_s1 + $0x48] sm:$0xff]  ;;  %v1713_v28 = vld [vmem:[%s2654_s1] sm:$0xff]  ;;  %vm611_vm2 = vcmask 523264   ;;  %vm642_vm3 = vcmask 97280   ;;  %s1277_s20 = sshll.u32 %s2668_s15, 4  ;;  %s1278_s20 = int_to_ptr.hbm [resolvable:$true] %s1277_s20 }
  0x14   :  { %496 = vmatpush.bf16.msra.mxu2 %v1732_v18  ;;  %v1731_v22 = vld [vmem:[%s2654_s1 + $0x90] sm:$0xff]  ;;  %v1730_v26 = vld [vmem:[%s2654_s1 + $0x88] sm:$0xff]  ;;  %v1721_v29 = vld [vmem:[%s2654_s1 + $0x40] sm:$0xff] }
  0x15   :  { %509 = vmatpush.bf16.msra.mxu3 %v1740_v19  ;;  %v1739_v23 = vld [vmem:[%s2654_s1 + $0xd0] sm:$0xff]  ;;  %v1738_v27 = vld [vmem:[%s2654_s1 + $0xc8] sm:$0xff]  ;;  %v52_v30 = vld [vmem:[%s2653_s0] sm:$0xff] }
  0x16   :  { %471 = vmatpush.bf16.msra.mxu0 %v1715_v20  ;;  %v53_v31 = vld [vmem:[%s2653_s0 + $0x8] sm:$0xff]  ;;  %v1752_v32 = vld [vmem:[%s2654_s1 + $0x138] sm:$0xff]  ;;  %v1729_v34 = vld [vmem:[%s2654_s1 + $0x80] sm:$0xff]  ;;  %v59_v36 = vpack.c.bf16 %v52_v30, %v52_v30 }
  0x17   :  { %484 = vmatpush.bf16.msra.mxu1 %v1723_v21  ;;  %v1760_v33 = vld [vmem:[%s2654_s1 + $0x178] sm:$0xff]  ;;  %v1737_v35 = vld [vmem:[%s2654_s1 + $0xc0] sm:$0xff]  ;;  %v54_v37 = vld [vmem:[%s2653_s0 + $0x10] sm:$0xff]  ;;  %v60_v39 = vpack.c.bf16 %v53_v31, %v53_v31 }
  0x18   :  { %497 = vmatpush.bf16.msra.mxu2 %v1731_v22  ;;  %v55_v38 = vld [vmem:[%s2653_s0 + $0x18] sm:$0xff]  ;;  %v1751_v40 = vld [vmem:[%s2654_s1 + $0x130] sm:$0xff]  ;;  %v61_v42 = vpack.c.bf16 %v54_v37, %v54_v37  ;;  %v1750_v44 = vld [vmem:[%s2654_s1 + $0x128] sm:$0xff] }
  0x19   :  { %510 = vmatpush.bf16.msra.mxu3 %v1739_v23  ;;  %v1759_v41 = vld [vmem:[%s2654_s1 + $0x170] sm:$0xff]  ;;  %v62_v43 = vpack.c.bf16 %v55_v38, %v55_v38  ;;  %v1758_v45 = vld [vmem:[%s2654_s1 + $0x168] sm:$0xff]  ;;  %v1749_v46 = vld [vmem:[%s2654_s1 + $0x120] sm:$0xff] }
  0x1a   :  { %472 = vmatpush.bf16.msra.mxu0 %v1714_v24  ;;  %v1757_v47 = vld [vmem:[%s2654_s1 + $0x160] sm:$0xff]  ;;  %v1748_v48 = vld [vmem:[%s2654_s1 + $0x118] sm:$0xff]  ;;  %v1747_v50 = vld [vmem:[%s2654_s1 + $0x110] sm:$0xff] }
  0x1b   :  { %485 = vmatpush.bf16.msra.mxu1 %v1722_v25  ;;  %v1756_v49 = vld [vmem:[%s2654_s1 + $0x158] sm:$0xff]  ;;  %v1755_v51 = vld [vmem:[%s2654_s1 + $0x150] sm:$0xff]  ;;  %v1746_v52 = vld [vmem:[%s2654_s1 + $0x108] sm:$0xff] }
  0x1c   :  { %498 = vmatpush.bf16.msra.mxu2 %v1730_v26  ;;  %v1754_v53 = vld [vmem:[%s2654_s1 + $0x148] sm:$0xff]  ;;  %v1745_v54 = vld [vmem:[%s2654_s1 + $0x100] sm:$0xff]  ;;  %v58_v61 = vld [vmem:[%s2653_s0 + $0x30] sm:$0xff] }
  0x1d   :  { %511 = vmatpush.bf16.msra.mxu3 %v1738_v27  ;;  %v1753_v55 = vld [vmem:[%s2654_s1 + $0x140] sm:$0xff]  ;;  %v57_v57 = vld [vmem:[%s2653_s0 + $0x28] sm:$0xff]  ;;  %v65_v62 = vpack.c.bf16 %v58_v61, %v58_v61  ;;  %v573_v63 = vld [vmem:[%s2656_s3 + $0x78] sm:$0xff] }
  0x1e   :  { %473 = vmatpush.bf16.msra.mxu0 %v1713_v28  ;;  %v56_v56 = vld [vmem:[%s2653_s0 + $0x20] sm:$0xff]  ;;  %v64_v60 = vpack.c.bf16 %v57_v57, %v57_v57  ;;  %v572_v0 = vld [vmem:[%s2656_s3 + $0x70] sm:$0xff]  ;;  %v571_v1 = vld [vmem:[%s2656_s3 + $0x68] sm:$0xff] }
  0x1f   :  { %486 = vmatpush.bf16.msra.mxu1 %v1721_v29  ;;  %v1761_v58 = vld [vmem:[%s2654_s1 + $0x180] sm:$0xff]  ;;  %v63_v59 = vpack.c.bf16 %v56_v56, %v56_v56  ;;  %v569_v3 = vld [vmem:[%s2656_s3 + $0x58] sm:$0xff]  ;;  %v568_v4 = vld [vmem:[%s2656_s3 + $0x50] sm:$0xff] }
  0x20   :  { %499 = vmatpush.bf16.msra.mxu2 %v1729_v34  ;;  %v570_v2 = vld [vmem:[%s2656_s3 + $0x60] sm:$0xff]  ;;  %v567_v5 = vld [vmem:[%s2656_s3 + $0x48] sm:$0xff]  ;;  %v565_v9 = vld [vmem:[%s2656_s3 + $0x38] sm:$0xff] }
  0x21   :  { %512 = vmatpush.bf16.msra.mxu3 %v1737_v35  ;;  %474 = vmatmul.bf16.vlgmr.msra.gmra.mxu0 %v59_v36  ;;  %v566_v8 = vld [vmem:[%s2656_s3 + $0x40] sm:$0xff]  ;;  %v564_v10 = vld [vmem:[%s2656_s3 + $0x30] sm:$0xff]  ;;  %v563_v11 = vld [vmem:[%s2656_s3 + $0x28] sm:$0xff] }
  0x22   :  { %518 = vmatpush.bf16.msrb.mxu0 %v1752_v32  ;;  %487 = vmatmul.bf16.vlgmr.msra.gmra.mxu1 %v60_v39  ;;  %v562_v12 = vld [vmem:[%s2656_s3 + $0x20] sm:$0xff]  ;;  %v561_v15 = vld [vmem:[%s2656_s3 + $0x18] sm:$0xff]  ;;  %v560_v18 = vld [vmem:[%s2656_s3 + $0x10] sm:$0xff] }
  0x23   :  { %531 = vmatpush.bf16.msrb.mxu1 %v1760_v33  ;;  %500 = vmatmul.bf16.vlgmr.msra.gmra.mxu2 %v61_v42  ;;  %v559_v19 = vld [vmem:[%s2656_s3 + $0x8] sm:$0xff]  ;;  %v558_v20 = vld [vmem:[%s2656_s3] sm:$0xff]  ;;  %v606_v23 = vld [vmem:[%s2658_s5 + $0x38] sm:$0xff] }
  0x24   :  { %513 = vmatmul.bf16.vlgmr.msra.gmra.mxu3 %v62_v43  ;;  %v605_v24 = vld [vmem:[%s2658_s5 + $0x30] sm:$0xff]  ;;  %v1819_v25 = vld [vmem:[%s2655_s2] ss:$0 sm:$0xff]  ;;  %623 = vmatpush.msrb.mxu2 %v606_v23  ;;  %v604_v26 = vld [vmem:[%s2658_s5 + $0x28] sm:$0xff] }
  0x25   :  { %578 = vmatpush.msrb.mxu3 %v573_v63  ;;  %v603_v27 = vld [vmem:[%s2658_s5 + $0x20] sm:$0xff]  ;;  %v602_v29 = vld [vmem:[%s2658_s5 + $0x18] sm:$0xff]  ;;  %v601_v32 = vld [vmem:[%s2658_s5 + $0x10] sm:$0xff] }
  0x26   :  { %519 = vmatpush.bf16.msrb.mxu0 %v1751_v40  ;;  %624 = vmatpush.msrb.mxu2 %v605_v24  ;;  %v671_v57 = vld [vmem:[%s2662_s9] sm:$0xff]  ;;  %v706_v63 = vld [vmem:[%s2664_s11 + $0x10] sm:$0xff]  ;;  %v1631_v24 = vld [vmem:[%s2666_s13 + $0x118] sm:$0xf] }
  0x27   :  { %532 = vmatpush.bf16.msrb.mxu1 %v1759_v41  ;;  %579 = vmatpush.msrb.mxu3 %v572_v0  ;;  %v708_v61 = vld [vmem:[%s2664_s11 + $0x20] sm:$0xff] }
  0x28   :  { %625 = vmatpush.msrb.mxu2 %v604_v26  ;;  %v1822_v0 = vld [vmem:[%s2661_s8] ss:$0 sm:$0xff]  ;;  %v1797_v26 = vld [vmem:[%s2666_s13 + $0x11c] sm:$0xf] }
  0x29   :  { %580 = vmatpush.msrb.mxu3 %v571_v1 }
  0x2a   :  { %520 = vmatpush.bf16.msrb.mxu0 %v1750_v44  ;;  %626 = vmatpush.msrb.mxu2 %v603_v27  ;;  %v600_v44 = vld [vmem:[%s2658_s5 + $0x8] sm:$0xff]  ;;  %v1633_v27 = vld [vmem:[%s2666_s13 + $0x134] sm:$0xf0] }
  0x2b   :  { %533 = vmatpush.bf16.msrb.mxu1 %v1758_v45  ;;  %581 = vmatpush.msrb.mxu3 %v570_v2  ;;  %v599_v45 = vld [vmem:[%s2658_s5] sm:$0xff] }
  0x2c   :  { %627 = vmatpush.msrb.mxu2 %v602_v29  ;;  %v1801_v29 = vld [vmem:[%s2666_s13 + $0x138] sm:$0xf0] }
  0x2d   :  { %582 = vmatpush.msrb.mxu3 %v569_v3 }
  0x2e   :  { %521 = vmatpush.bf16.msrb.mxu0 %v1749_v46  ;;  %628 = vmatpush.msrb.mxu2 %v601_v32  ;;  %v637_v46 = vld [vmem:[%s2660_s7 + $0x8] sm:$0xf]  ;;  %v1793_v32 = vld [vmem:[%s2666_s13 + $0xf8] sm:$0xf0] }
  0x2f   :  { %534 = vmatpush.bf16.msrb.mxu1 %v1757_v47  ;;  %583 = vmatpush.msrb.mxu3 %v568_v4  ;;  %v1820_v47 = vld [vmem:[%s2657_s4] ss:$0 sm:$0xff]  ;;  %v705_v4 = vld [vmem:[%s2664_s11 + $0x8] sm:$0xff] }
  0x30   :  { %629 = vmatpush.msrb.mxu2 %v600_v44  ;;  %v1575_v44 = vld [vmem:[%s2666_s13 + $0xa8] sm:$0xf] }
  0x31   :  { %584 = vmatpush.msrb.mxu3 %v567_v5  ;;  %v704_v5 = vld [vmem:[%s2664_s11] sm:$0xff] }
  0x32   :  { %522 = vmatpush.bf16.msrb.mxu0 %v1748_v48  ;;  %630 = vmatpush.msrb.mxu2 %v599_v45  ;;  %v1786_v45 = vld [vmem:[%s2666_s13 + $0xc0] sm:$0xf0] }
  0x33   :  { %535 = vmatpush.bf16.msrb.mxu1 %v1756_v49  ;;  %585 = vmatpush.msrb.mxu3 %v566_v8  ;;  %v1811_v8 = vld [vmem:[%s2666_s13 + $0x18c] sm:$0xf] }
  0x34   :  { %1484 = vmatpush.msk.msra.mxu2 %vm646_vm1, %v637_v46  ;;  %v1669_v46 = vld [vmem:[%s2666_s13 + $0x174] sm:$0xf0] }
  0x35   :  { %586 = vmatpush.msrb.mxu3 %v565_v9 }
  0x36   :  { %523 = vmatpush.bf16.msrb.mxu0 %v1747_v50 }
  0x37   :  { %536 = vmatpush.bf16.msrb.mxu1 %v1755_v51  ;;  %587 = vmatpush.msrb.mxu3 %v564_v10  ;;  %v636_v51 = vld [vmem:[%s2660_s7] sm:$0xff]  ;;  %v1689_v10 = vld [vmem:[%s2666_s13 + $0x1a4] sm:$0xf0] }
  0x38   :  { %665 = vmatpush.msra.mxu2 %v636_v51  ;;  %v1583_v51 = vld [vmem:[%s2666_s13 + $0xb0] sm:$0xf] }
  0x39   :  { %588 = vmatpush.msrb.mxu3 %v563_v11  ;;  %v1695_v11 = vld [vmem:[%s2666_s13 + $0x190] sm:$0xf] }
  0x3a   :  { %524 = vmatpush.bf16.msrb.mxu0 %v1746_v52  ;;  %v672_v52 = vld [vmem:[%s2662_s9 + $0x8] sm:$0xf] }
  0x3b   :  { %537 = vmatpush.bf16.msrb.mxu1 %v1754_v53  ;;  %589 = vmatpush.msrb.mxu3 %v562_v12  ;;  %v1821_v53 = vld [vmem:[%s2659_s6] ss:$0 sm:$0xff]  ;;  %v1815_v12 = vld [vmem:[%s2666_s13 + $0x1a8] sm:$0xf0] }
  0x3d   :  { %590 = vmatpush.msrb.mxu3 %v561_v15  ;;  %v1659_v15 = vld [vmem:[%s2666_s13 + $0x150] sm:$0xf] }
  0x3e   :  { %525 = vmatpush.bf16.msrb.mxu0 %v1745_v54 }
  0x3f   :  { %538 = vmatpush.bf16.msrb.mxu1 %v1753_v55  ;;  %591 = vmatpush.msrb.mxu3 %v560_v18 }
  0x41   :  { %526 = vmatmul.bf16.vlgmr.msrb.gmra.mxu0 %v63_v59  ;;  %592 = vmatpush.msrb.mxu3 %v559_v19  ;;  %v710_v59 = vld [vmem:[%s2664_s11 + $0x30] sm:$0xff] }
  0x42   :  { %551 = vmatpush.bf16.msra.mxu0 %v1761_v58  ;;  %539 = vmatmul.bf16.vlgmr.msrb.gmra.mxu1 %v64_v60  ;;  %v711_v58 = vld [vmem:[%s2664_s11 + $0x38] sm:$0xff]  ;;  %v709_v60 = vld [vmem:[%s2664_s11 + $0x28] sm:$0xff]  ;;  %v1661_v19 = vld [vmem:[%s2666_s13 + $0x16c] sm:$0xf0] }
  0x43   :  { %593 = vmatpush.msrb.mxu3 %v558_v20  ;;  %v1667_v20 = vld [vmem:[%s2666_s13 + $0x158] sm:$0xf] }
  0x46   :  { %727 = vmatpush.msrb.mxu0 %v711_v58  ;;  %v1779_v58 = vld [vmem:[%s2666_s13 + $0x88] sm:$0xf0] }
  0x48   :  { %728 = vmatpush.msrb.mxu0 %v710_v59 }
  0x4a   :  { %729 = vmatpush.msrb.mxu0 %v709_v60 }
  0x4c   :  { %730 = vmatpush.msrb.mxu0 %v708_v61 }
  0x51   :  { %1482 = vmatmul.msk.bf16.vlgmr.msra.gmra.mxu0 %vm462_vm0, %v65_v62  ;;  %v707_v62 = vld [vmem:[%s2664_s11 + $0x18] sm:$0xff] }
  0x52   :  { %731 = vmatpush.msrb.mxu0 %v707_v62  ;;  %v1776_v62 = vld [vmem:[%s2666_s13 + $0x74] sm:$0xf] }
  0x54   :  { %732 = vmatpush.msrb.mxu0 %v706_v63  ;;  %v1791_v63 = vld [vmem:[%s2666_s13 + $0xec] sm:$0xf] }
  0x56   :  { %733 = vmatpush.msrb.mxu0 %v705_v4 }
  0x58   :  { %734 = vmatpush.msrb.mxu0 %v704_v5  ;;  %v1519_v5 = vld [vmem:[%s2666_s13 + $0x38] sm:$0xf] }
  0x9e   :  { %v475_v6 = vpop.f32.mrf.mxu0 }
  0x9f   :  { %v488_v7 = vpop.f32.mrf.mxu1  ;;  %v476_v28 = vadd.f32 %v1819_v25, %v475_v6  ;;  %v1687_v6 = vld [vmem:[%s2666_s13 + $0x188] sm:$0xf]  ;;  %v1800_v25 = vld [vmem:[%s2666_s13 + $0x130] sm:$0xf0] }
  0xa1   :  { %v489_v33 = vadd.f32 %v488_v7, %v476_v28  ;;  %v1814_v7 = vld [vmem:[%s2666_s13 + $0x1a0] sm:$0xf0]  ;;  %v1639_v28 = vld [vmem:[%s2666_s13 + $0x120] sm:$0xf] }
  0xa2   :  { %v1688_v9 = vor.u32 %v1814_v7, %v1687_v6  ;;  %v1772_v6 = vld [vmem:[%s2666_s13 + $0x50] sm:$0xf0] }
  0xa4   :  { %1109 = vmatpush.bf16.msra.mxu1 %v1688_v9 }
  0xa6   :  { %v477_v13 = vpop.f32.mrf.mxu0  ;;  %v501_v16 = vpop.f32.mrf.mxu2 }
  0xa7   :  { %v490_v14 = vpop.f32.mrf.mxu1  ;;  %v514_v17 = vpop.f32.mrf.mxu3  ;;  %v502_v34 = vadd.f32 %v501_v16, %v489_v33  ;;  %v1692_v13 = vor.u32 %v1811_v8, %v1689_v10  ;;  %v1807_v16 = vld [vmem:[%s2666_s13 + $0x168] sm:$0xf0]  ;;  %v1636_v33 = vor.u32 %v1797_v26, %v1633_v27  ;;  %v1769_v10 = vld [vmem:[%s2666_s13 + $0x3c] sm:$0xf]  ;;  %v1493_v26 = vld [vmem:[%s2666_s13 + $0x1c] sm:$0xf0] }
  0xa8   :  { %v1696_v14 = vor.u32 %v1815_v12, %v1695_v11  ;;  %v1660_v18 = vor.u32 %v1807_v16, %v1659_v15  ;;  %v1784_v11 = vld [vmem:[%s2666_s13 + $0xb4] sm:$0xf]  ;;  %v1585_v12 = vld [vmem:[%s2666_s13 + $0xcc] sm:$0xf0]  ;;  %v1773_v15 = vld [vmem:[%s2666_s13 + $0x58] sm:$0xf0] }
  0xa9   :  { %v515_v37 = vadd.f32 %v514_v17, %v502_v34  ;;  %v1804_v17 = vld [vmem:[%s2666_s13 + $0x154] sm:$0xf]  ;;  %v1640_v34 = vor.u32 %v1801_v29, %v1639_v28  ;;  %v1823_v16 = vld [vmem:[%s2663_s10] ss:$0 sm:$0xff]  ;;  %v1499_v27 = vld [vmem:[%s2666_s13 + $0x8] sm:$0xf] }
  0xaa   :  { %1135 = vmatpush.bf16.msra.mxu3 %v1696_v14  ;;  %1110 = vmatpush.bf16.msra.mxu1 %v1660_v18  ;;  %v1527_v14 = vld [vmem:[%s2666_s13 + $0x40] sm:$0xf]  ;;  %v1766_v28 = vld [vmem:[%s2666_s13 + $0x20] sm:$0xf0]  ;;  %v1703_v29 = vld [vmem:[%s2666_s13 + $0x198] sm:$0xf] }
  0xab   :  { %v1491_v18 = vld [vmem:[%s2666_s13] sm:$0xf] }
  0xae   :  { %v503_v21 = vpop.f32.mrf.mxu2 }
  0xaf   :  { %v516_v22 = vpop.f32.mrf.mxu3  ;;  %v1808_v21 = vld [vmem:[%s2666_s13 + $0x170] sm:$0xf0] }
  0xb0   :  { %v1664_v22 = vor.u32 %v1804_v17, %v1661_v19  ;;  %v1668_v23 = vor.u32 %v1808_v21, %v1667_v20  ;;  %v1520_v17 = vor.u32 %v1772_v6, %v1519_v5  ;;  %v1765_v19 = vld [vmem:[%s2666_s13 + $0x18] sm:$0xf0]  ;;  %v1588_v20 = vor.u32 %v1784_v11, %v1585_v12  ;;  %v1795_v6 = vld [vmem:[%s2666_s13 + $0x108] sm:$0xf0]  ;;  %v1627_v11 = vld [vmem:[%s2666_s13 + $0xf8] sm:$0xf] }
  0xb1   :  { %v1796_v12 = vld [vmem:[%s2666_s13 + $0x110] sm:$0xf0] }
  0xb2   :  { %1136 = vmatpush.bf16.msra.mxu3 %v1668_v23  ;;  %v1762_v23 = vld [vmem:[%s2666_s13 + $0x4] sm:$0xf] }
  0xb6   :  { %1137 = vmatpush.bf16.msra.mxu3 %v1640_v34  ;;  %v1705_v34 = vld [vmem:[%s2666_s13 + $0x1b4] sm:$0xf0] }
  0xbe   :  { %v527_v30 = vpop.f32.mrf.mxu0 }
  0xbf   :  { %v540_v31 = vpop.f32.mrf.mxu1  ;;  %v528_v38 = vadd.f32 %v527_v30, %v515_v37  ;;  %v1632_v30 = vor.u32 %v1800_v25, %v1631_v24  ;;  %v1697_v37 = vld [vmem:[%s2666_s13 + $0x1ac] sm:$0xf0]  ;;  %v1777_v24 = vld [vmem:[%s2666_s13 + $0x7c] sm:$0xf]  ;;  %v1557_v25 = vld [vmem:[%s2666_s13 + $0x94] sm:$0xf0] }
  0xc1   :  { %v541_v39 = vadd.f32 %v540_v31, %v528_v38  ;;  %v1603_v31 = vld [vmem:[%s2666_s13 + $0xe0] sm:$0xf]  ;;  %1111 = vmatpush.bf16.msra.mxu1 %v1632_v30  ;;  %v1816_v30 = vld [vmem:[%s2666_s13 + $0x1b0] sm:$0xf0] }
  0xc2   :  { %v1605_v38 = vld [vmem:[%s2666_s13 + $0xfc] sm:$0xf0] }
  0xc6   :  { %v529_v35 = vpop.f32.mrf.mxu0 }
  0xc7   :  { %v542_v36 = vpop.f32.mrf.mxu1  ;;  %v1790_v35 = vld [vmem:[%s2666_s13 + $0xe4] sm:$0xf] }
  0xc8   :  { %v1812_v36 = vld [vmem:[%s2666_s13 + $0x194] sm:$0xf] }
  0xce   :  { %v553_v40 = vpop.f32.mrf.mxu0 }
  0xcf   :  { %v554_v41 = vadd.f32 %v553_v40, %v541_v39  ;;  %v1611_v39 = vld [vmem:[%s2666_s13 + $0xe8] sm:$0xf]  ;;  %v1794_v40 = vld [vmem:[%s2666_s13 + $0x100] sm:$0xf0] }
  0xd1   :  { %v557_v42 = vmax.f32 %v554_v41, 0.0  ;;  %v1700_v41 = vor.u32 %v1812_v36, %v1697_v37  ;;  %v1817_v36 = vld [vmem:[%s2666_s13 + $0x1b8] sm:$0xf0]  ;;  %v1560_v37 = vor.u32 %v1777_v24, %v1557_v25  ;;  %v1778_v25 = vld [vmem:[%s2666_s13 + $0x84] sm:$0xf] }
  0xd2   :  { %v1781_v24 = vld [vmem:[%s2666_s13 + $0x98] sm:$0xf0] }
  0xd3   :  { %594 = vmatmul.f32.vlgmr.msrb.gmra.mxu3 %v557_v42  ;;  %v1805_v42 = vld [vmem:[%s2666_s13 + $0x15c] sm:$0xf]  ;;  %1148 = vmatpush.bf16.msra.mxu0 %v1700_v41  ;;  %v1704_v41 = vor.u32 %v1816_v30, %v1703_v29  ;;  %v1782_v29 = vld [vmem:[%s2666_s13 + $0xa0] sm:$0xf0] }
  0xd6   :  { %v555_v43 = vpop.f32.mrf.mxu0 }
  0xd7   :  { %v1604_v43 = vor.u32 %v1793_v32, %v1603_v31  ;;  %v1813_v31 = vld [vmem:[%s2666_s13 + $0x19c] sm:$0xf] }
  0xd9   :  { %1112 = vmatpush.bf16.msra.mxu1 %v1604_v43 }
 0x156   :  { %v595_v48 = vpop.f32.mrf.mxu3 }
 0x157   :  { %v596_v49 = vadd.f32 %v1820_v47, %v595_v48  ;;  %v1608_v47 = vor.u32 %v1790_v35, %v1605_v38  ;;  %v1612_v48 = vor.u32 %v1794_v40, %v1611_v39  ;;  %v1711_v35 = vld [vmem:[%s2666_s13 + $0x1a0] sm:$0xf]  ;;  %v1496_v39 = vor.u32 %v1762_v23, %v1493_v26 }
 0x158   :  { %v1500_v40 = vor.u32 %v1766_v28, %v1499_v27  ;;  %v1563_v23 = vld [vmem:[%s2666_s13 + $0x80] sm:$0xf]  ;;  %v1571_v28 = vld [vmem:[%s2666_s13 + $0x88] sm:$0xf] }
 0x159   :  { %v598_v50 = vmax.f32 %v596_v49, 0.0  ;;  %v1783_v49 = vld [vmem:[%s2666_s13 + $0xac] sm:$0xf]  ;;  %1138 = vmatpush.bf16.msra.mxu3 %v1612_v48  ;;  %v1677_v48 = vld [vmem:[%s2666_s13 + $0x17c] sm:$0xf0]  ;;  %v1564_v26 = vor.u32 %v1781_v24, %v1563_v23 }
 0x15a   :  { %v1565_v27 = vld [vmem:[%s2666_s13 + $0x9c] sm:$0xf0] }
 0x15b   :  { %1483 = vmatmul.msk.f32.vlgmr.msrb.gmra.mxu2 %vm611_vm2, %v598_v50  ;;  %v1577_v50 = vld [vmem:[%s2666_s13 + $0xc4] sm:$0xf0]  ;;  %v1568_v30 = vor.u32 %v1778_v25, %v1565_v27 }
 0x15c   :  { %1486 = vmatpush.msk.msrb.mxu2 %vm646_vm1, %v672_v52  ;;  %v1672_v52 = vor.u32 %v1805_v42, %v1669_v46  ;;  %v1580_v60 = vor.u32 %v1783_v49, %v1577_v50  ;;  %v1675_v42 = vld [vmem:[%s2666_s13 + $0x160] sm:$0xf]  ;;  %v1809_v46 = vld [vmem:[%s2666_s13 + $0x178] sm:$0xf0]  ;;  %v1683_v49 = vld [vmem:[%s2666_s13 + $0x168] sm:$0xf] }
 0x15d   :  { %v1810_v50 = vld [vmem:[%s2666_s13 + $0x180] sm:$0xf0] }
 0x15e   :  { %698 = vmatpush.msrb.mxu2 %v671_v57  ;;  %1149 = vmatpush.bf16.msra.mxu0 %v1672_v52  ;;  %v1547_v57 = vld [vmem:[%s2666_s13 + $0x70] sm:$0xf] }
 0x15f   :  { %v1548_v4 = vor.u32 %v1779_v58, %v1547_v57  ;;  %v1802_v58 = vld [vmem:[%s2666_s13 + $0x140] sm:$0xf0] }
 0x1de   :  { %v632_v54 = vpop.f32.mrf.mxu2 }
 0x1df   :  { %v633_v55 = vadd.f32 %v1821_v53, %v632_v54  ;;  %v1787_v53 = vld [vmem:[%s2666_s13 + $0xc8] sm:$0xf0]  ;;  %v1798_v54 = vld [vmem:[%s2666_s13 + $0x124] sm:$0xf] }
 0x1e0   :  { %v1584_v61 = vor.u32 %v1787_v53, %v1583_v51  ;;  %v1676_v51 = vor.u32 %v1809_v46, %v1675_v42  ;;  %v1684_v53 = vor.u32 %v1810_v50, %v1683_v49  ;;  %v1767_v42 = vld [vmem:[%s2666_s13 + $0x28] sm:$0xf0]  ;;  %v1768_v46 = vld [vmem:[%s2666_s13 + $0x30] sm:$0xf0]  ;;  %v1824_v50 = vld [vmem:[%s2665_s12] ss:$0 sm:$0xff] }
 0x1e1   :  { %v635_v56 = vmax.f32 %v633_v55, 0.0  ;;  %v1641_v55 = vld [vmem:[%s2666_s13 + $0x13c] sm:$0xf0]  ;;  %s1879_s12 = smov [#allocation2]  }
 0x1e2   :  { %v1644_v59 = vor.u32 %v1798_v54, %v1641_v55  ;;  %1139 = vmatpush.bf16.msra.mxu3 %v1584_v61  ;;  %v1770_v54 = vld [vmem:[%s2666_s13 + $0x44] sm:$0xf]  ;;  %v1529_v55 = vld [vmem:[%s2666_s13 + $0x5c] sm:$0xf0] }
 0x1e3   :  { %1485 = vmatmul.msk.f32.vlgmr.msra.gmra.mxu2 %vm642_vm3, %v635_v56  ;;  %v1576_v56 = vor.u32 %v1786_v45, %v1575_v44  ;;  %v1708_v44 = vor.u32 %v1813_v31, %v1705_v34  ;;  %v1712_v45 = vor.u32 %v1817_v36, %v1711_v35  ;;  %v1532_v57 = vor.u32 %v1770_v54, %v1529_v55  ;;  %v1771_v34 = vld [vmem:[%s2666_s13 + $0x4c] sm:$0xf]  ;;  %v1537_v35 = vld [vmem:[%s2666_s13 + $0x64] sm:$0xf0]  ;;  %v1543_v36 = vld [vmem:[%s2666_s13 + $0x50] sm:$0xf] }
 0x1e4   :  { %1122 = vmatpush.bf16.msra.mxu2 %v1692_v13  ;;  %1150 = vmatpush.bf16.msra.mxu0 %v1644_v59  ;;  %v1521_v13 = vld [vmem:[%s2666_s13 + $0x54] sm:$0xf0]  ;;  %v1799_v59 = vld [vmem:[%s2666_s13 + $0x12c] sm:$0xf]  ;;  %v1572_v31 = vor.u32 %v1782_v29, %v1571_v28  ;;  %v2598_v55 = vld [vmem:[%s2667_s14] sm:$0x7f] }
 0x1e5   :  { %1113 = vmatpush.bf16.msra.mxu1 %v1576_v56  ;;  %v1524_v21 = vor.u32 %v1769_v10, %v1521_v13  ;;  %v1647_v56 = vld [vmem:[%s2666_s13 + $0x128] sm:$0xf]  ;;  %v1628_v13 = vor.u32 %v1796_v12, %v1627_v11  ;;  %v812_v28 = vperm.slane %v2598_v55, 5  ;;  %s1275_s14 = sshll.u32 %s1879_s12, 4  ;;  %s1276_s14 = int_to_ptr.vmem [resolvable:$true] %s1275_s14 }
 0x1e6   :  { %v1648_v61 = vor.u32 %v1802_v58, %v1647_v56  ;;  %v807_v56 = vperm.slane %v2598_v55, 0 }
 0x1e8   :  { %1123 = vmatpush.bf16.msra.mxu2 %v1664_v22  ;;  %v1528_v22 = vor.u32 %v1773_v15, %v1527_v14  ;;  %v1591_v14 = vld [vmem:[%s2666_s13 + $0xb8] sm:$0xf]  ;;  %v1788_v15 = vld [vmem:[%s2666_s13 + $0xd0] sm:$0xf0] }
 0x1e9   :  { %1114 = vmatpush.bf16.msra.mxu1 %v1548_v4  ;;  %v1619_v4 = vld [vmem:[%s2666_s13 + $0xf0] sm:$0xf] }
 0x1ec   :  { %1124 = vmatpush.bf16.msra.mxu2 %v1636_v33  ;;  %v1492_v33 = vor.u32 %v1765_v19, %v1491_v18  ;;  %v1593_v18 = vld [vmem:[%s2666_s13 + $0xd4] sm:$0xf0]  ;;  %v1599_v19 = vld [vmem:[%s2666_s13 + $0xc0] sm:$0xf] }
 0x1ed   :  { %1115 = vmatpush.bf16.msra.mxu1 %v1520_v17  ;;  %v1592_v17 = vor.u32 %v1788_v15, %v1591_v14 }
 0x1f0   :  { %1125 = vmatpush.bf16.msra.mxu2 %v1608_v47  ;;  %v1806_v47 = vld [vmem:[%s2666_s13 + $0x164] sm:$0xf] }
 0x1f1   :  { %1116 = vmatpush.bf16.msra.mxu1 %v1492_v33  ;;  %v1680_v52 = vor.u32 %v1806_v47, %v1677_v48  ;;  %v1774_v33 = vld [vmem:[%s2666_s13 + $0x60] sm:$0xf0] }
 0x1f4   :  { %1126 = vmatpush.bf16.msra.mxu2 %v1580_v60  ;;  %v1649_v60 = vld [vmem:[%s2666_s13 + $0x144] sm:$0xf0] }
 0x1f5   :  { %1161 = vmatpush.bf16.msrb.mxu1 %v1704_v41  ;;  %v1507_v41 = vld [vmem:[%s2666_s13 + $0x10] sm:$0xf] }
 0x1f6   :  { %v1508_v47 = vor.u32 %v1767_v42, %v1507_v41 }
 0x1f9   :  { %1162 = vmatpush.bf16.msrb.mxu1 %v1676_v51 }
 0x1fd   :  { %1163 = vmatpush.bf16.msrb.mxu1 %v1648_v61 }
 0x266   :  { %v667_v1 = vpop.f32.mrf.mxu2 }
 0x267   :  { %v668_v2 = vadd.f32 %v1822_v0, %v667_v1  ;;  %v1613_v0 = vld [vmem:[%s2666_s13 + $0x104] sm:$0xf0]  ;;  %v1549_v1 = vld [vmem:[%s2666_s13 + $0x8c] sm:$0xf0] }
 0x268   :  { %v1616_v7 = vor.u32 %v1791_v63, %v1613_v0  ;;  %v1552_v8 = vor.u32 %v1776_v62, %v1549_v1  ;;  %v1652_v62 = vor.u32 %v1799_v59, %v1649_v60  ;;  %v1655_v63 = vld [vmem:[%s2666_s13 + $0x130] sm:$0xf]  ;;  %v1803_v0 = vld [vmem:[%s2666_s13 + $0x148] sm:$0xf0] }
 0x269   :  { %v670_v3 = vmax.f32 %v668_v2, 0.0  ;;  %v1555_v2 = vld [vmem:[%s2666_s13 + $0x78] sm:$0xf]  ;;  %v1656_v1 = vor.u32 %v1803_v0, %v1655_v63  ;;  %v808_v63 = vperm.slane %v2598_v55, 1 }
 0x26a   :  { %1151 = vmatpush.bf16.msra.mxu0 %v1616_v7  ;;  %1127 = vmatpush.bf16.msra.mxu2 %v1552_v8  ;;  %v1792_v7 = vld [vmem:[%s2666_s13 + $0xf4] sm:$0xf]  ;;  %v1621_v8 = vld [vmem:[%s2666_s13 + $0x10c] sm:$0xf0] }
 0x26b   :  { %1487 = vmatmul.msk.f32.vlgmr.msrb.gmra.mxu2 %vm642_vm3, %v670_v3  ;;  %v1780_v3 = vld [vmem:[%s2666_s13 + $0x90] sm:$0xf0]  ;;  %v1624_v10 = vor.u32 %v1792_v7, %v1621_v8 }
 0x26c   :  { %v1556_v9 = vor.u32 %v1780_v3, %v1555_v2  ;;  %v1763_v2 = vld [vmem:[%s2666_s13 + $0xc] sm:$0xf]  ;;  %v1501_v3 = vld [vmem:[%s2666_s13 + $0x24] sm:$0xf0] }
 0x26d   :  { %v1504_v5 = vor.u32 %v1763_v2, %v1501_v3 }
 0x26e   :  { %1140 = vmatpush.bf16.msra.mxu3 %v1556_v9  ;;  %1152 = vmatpush.bf16.msra.mxu0 %v1588_v20  ;;  %v1620_v9 = vor.u32 %v1795_v6, %v1619_v4  ;;  %v1789_v20 = vld [vmem:[%s2666_s13 + $0xd8] sm:$0xf0] }
 0x26f   :  { %1128 = vmatpush.bf16.msra.mxu2 %v1524_v21 }
 0x270   :  { %1164 = vmatpush.bf16.msrb.mxu1 %v1620_v9 }
 0x272   :  { %1141 = vmatpush.bf16.msra.mxu3 %v1528_v22  ;;  %1153 = vmatpush.bf16.msra.mxu0 %v1560_v37  ;;  %v1600_v22 = vor.u32 %v1789_v20, %v1599_v19  ;;  %v1775_v37 = vld [vmem:[%s2666_s13 + $0x68] sm:$0xf0] }
 0x273   :  { %1129 = vmatpush.bf16.msra.mxu2 %v1496_v39  ;;  %v1540_v39 = vor.u32 %v1771_v34, %v1537_v35 }
 0x274   :  { %1165 = vmatpush.bf16.msrb.mxu1 %v1592_v17 }
 0x276   :  { %1142 = vmatpush.bf16.msra.mxu3 %v1500_v40  ;;  %1154 = vmatpush.bf16.msra.mxu0 %v1532_v57  ;;  %v1544_v40 = vor.u32 %v1775_v37, %v1543_v36  ;;  %v810_v57 = vperm.slane %v2598_v55, 3 }
 0x277   :  { %1174 = vmatpush.bf16.msrb.mxu2 %v1708_v44  ;;  %v1509_v44 = vld [vmem:[%s2666_s13 + $0x2c] sm:$0xf0] }
 0x278   :  { %1166 = vmatpush.bf16.msrb.mxu1 %v1564_v26 }
 0x27a   :  { %1187 = vmatpush.bf16.msrb.mxu3 %v1712_v45  ;;  %1155 = vmatpush.bf16.msra.mxu0 %v1504_v5  ;;  %v1515_v45 = vld [vmem:[%s2666_s13 + $0x18] sm:$0xf] }
 0x27b   :  { %1175 = vmatpush.bf16.msrb.mxu2 %v1680_v52  ;;  %v1516_v49 = vor.u32 %v1768_v46, %v1515_v45 }
 0x27e   :  { %1188 = vmatpush.bf16.msrb.mxu3 %v1684_v53 }
 0x27f   :  { %1176 = vmatpush.bf16.msrb.mxu2 %v1652_v62 }
 0x282   :  { %1189 = vmatpush.bf16.msrb.mxu3 %v1656_v1  ;;  %v809_v1 = vperm.slane %v2598_v55, 2 }
 0x283   :  { %1177 = vmatpush.bf16.msrb.mxu2 %v1624_v10 }
 0x286   :  { %1190 = vmatpush.bf16.msrb.mxu3 %v1628_v13 }
 0x28a   :  { %1191 = vmatpush.bf16.msrb.mxu3 %v1600_v22 }
 0x28e   :  { %1192 = vmatpush.bf16.msrb.mxu3 %v1572_v31 }
 0x292   :  { %1193 = vmatpush.bf16.msrb.mxu3 %v1544_v40 }
 0x296   :  { %1194 = vmatpush.bf16.msrb.mxu3 %v1516_v49 }
 0x2ee   :  { %v700_v32 = vpop.f32.mrf.mxu2 }
 0x2ef   :  { %v701_v38 = vadd.f32 %v1823_v16, %v700_v32  ;;  %v1785_v16 = vld [vmem:[%s2666_s13 + $0xbc] sm:$0xf]  ;;  %v1535_v32 = vld [vmem:[%s2666_s13 + $0x48] sm:$0xf] }
 0x2f0   :  { %v1596_v21 = vor.u32 %v1785_v16, %v1593_v18  ;;  %v811_v18 = vperm.slane %v2598_v55, 4 }
 0x2f1   :  { %v703_v43 = vmax.f32 %v701_v38, 0.0  ;;  %v1536_v38 = vor.u32 %v1774_v33, %v1535_v32 }
 0x2f2   :  { %1178 = vmatpush.bf16.msrb.mxu2 %v1596_v21 }
 0x2f3   :  { %1488 = vmatmul.msk.f32.vlgmr.msrb.gmra.mxu0 %vm611_vm2, %v703_v43  ;;  %v1764_v43 = vld [vmem:[%s2666_s13 + $0x14] sm:$0xf]  ;;  %1167 = vmatpush.bf16.msrb.mxu1 %v1536_v38 }
 0x2f4   :  { %v1512_v48 = vor.u32 %v1764_v43, %v1509_v44 }
 0x2f6   :  { %1179 = vmatpush.bf16.msrb.mxu2 %v1568_v30  ;;  %v813_v30 = vperm.slane %v2598_v55, 6 }
 0x2f7   :  { %1168 = vmatpush.bf16.msrb.mxu1 %v1508_v47 }
 0x2fa   :  { %1180 = vmatpush.bf16.msrb.mxu2 %v1540_v39 }
 0x2fe   :  { %1181 = vmatpush.bf16.msrb.mxu2 %v1512_v48 }
 0x370   :  { %v736_v51 = vpop.f32.mrf.mxu0 }
 0x371   :  { %v737_v52 = vadd.f32 %v1824_v50, %v736_v51 }
 0x373   :  { %v739_v53 = vmax.f32 %v737_v52, 0.0 }
 0x375   :  { %v740_v54 = vpack.c.bf16 %v739_v53, %v739_v53 }
 0x377   :  { %1117 = vmatmul.bf16.vlgmr.msra.gmra.mxu1 %v740_v54  ;;  %1130 = vmatmul.bf16.vlgmr.msra.gmra.mxu2 %v740_v54 }
 0x378   :  { %1143 = vmatmul.bf16.vlgmr.msra.gmra.mxu3 %v740_v54  ;;  %1156 = vmatmul.bf16.vlgmr.msra.gmra.mxu0 %v740_v54 }
 0x387   :  { %1169 = vmatmul.bf16.vlgmr.msrb.gmra.mxu1 %v740_v54  ;;  %1182 = vmatmul.bf16.vlgmr.msrb.gmra.mxu2 %v740_v54 }
 0x388   :  { %1195 = vmatmul.bf16.vlgmr.msrb.gmra.mxu3 %v740_v54 }
 0x3f4   :  { %v1118_v58 = vpop.f32.mrf.mxu1 }
 0x3f5   :  { %v2602_v59 = vadd.f32 %v1118_v58, %v807_v56  ;;  %v1157_v60 = vpop.f32.mrf.mxu0 }
 0x3f6   :  { %v2604_v61 = vadd.f32 %v1157_v60, %v810_v57 }
 0x3f7   :  { %vm1200_vm4 = vcmp.ge.f32.partialorder %v2602_v59, 0.0  ;;  %v1207_v62 = vsub.f32 0.0, %v2602_v59 }
 0x3f8   :  { %vm1203_vm5 = vcmp.ge.f32.partialorder %v2604_v61, 0.0  ;;  %v1210_v0 = vsub.f32 0.0, %v2604_v61 }
 0x3f9   :  { %v1214_v2 = vsel %vm1200_vm4, %v1207_v62, %v2602_v59 }
 0x3fa   :  { %v1221_v3 = vmul.f32 1.442695, %v1214_v2  ;;  %v1217_v4 = vsel %vm1203_vm5, %v1210_v0, %v2604_v61  ;;  %v1131_v5 = vpop.f32.mrf.mxu2 }
 0x3fb   :  { %v1227_v6 = vmul.f32 1.442695, %v1217_v4  ;;  %v2618_v7 = vadd.f32 %v1131_v5, %v808_v63  ;;  %v1144_v8 = vpop.f32.mrf.mxu3 }
 0x3fc   :  { %1825 = vpow2.f32 %v1221_v3  ;;  %v2620_v9 = vadd.f32 %v1144_v8, %v809_v1  ;;  %v1120_v10 = vpop.f32.mrf.mxu1 }
 0x3fd   :  { %1827 = vpow2.f32 %v1227_v6  ;;  %vm1201_vm6 = vcmp.ge.f32.partialorder %v2618_v7, 0.0  ;;  %v1208_v11 = vsub.f32 0.0, %v2618_v7  ;;  %v1159_v12 = vpop.f32.mrf.mxu0 }
 0x3fe   :  { %vm1202_vm7 = vcmp.ge.f32.partialorder %v2620_v9, 0.0  ;;  %v1209_v13 = vsub.f32 0.0, %v2620_v9 }
 0x3ff   :  { %v1215_v14 = vsel %vm1201_vm6, %v1208_v11, %v2618_v7 }
 0x400   :  { %v1223_v15 = vmul.f32 1.442695, %v1215_v14  ;;  %v1216_v16 = vsel %vm1202_vm7, %v1209_v13, %v2620_v9 }
 0x401   :  { %v1225_v17 = vmul.f32 1.442695, %v1216_v16 }
 0x402   :  { %v1826_v19 = vpop.eup %1825  ;;  %1829 = vpow2.f32 %v1223_v15  ;;  %v1133_v20 = vpop.f32.mrf.mxu2 }
 0x403   :  { %v1828_v21 = vpop.eup %1827  ;;  %v1235_v22 = vadd.f32 1.0, %v1826_v19  ;;  %1831 = vpow2.f32 %v1225_v17  ;;  %v1146_v23 = vpop.f32.mrf.mxu3 }
 0x404   :  { %v1238_v24 = vadd.f32 1.0, %v1828_v21  ;;  %v1170_v25 = vpop.f32.mrf.mxu1 }
 0x405   :  { %1833 = vrcp.f32 %v1235_v22  ;;  %v1171_v26 = vadd.f32 %v1170_v25, %v811_v18 }
 0x406   :  { %1835 = vrcp.f32 %v1238_v24 }
 0x407   :  { %vm1204_vm8 = vcmp.ge.f32.partialorder %v1171_v26, 0.0  ;;  %v1211_v27 = vsub.f32 0.0, %v1171_v26 }
 0x408   :  { %v1830_v29 = vpop.eup %1829 }
 0x409   :  { %v1832_v31 = vpop.eup %1831  ;;  %v1236_v32 = vadd.f32 1.0, %v1830_v29  ;;  %v1218_v33 = vsel %vm1204_vm8, %v1211_v27, %v1171_v26 }
 0x40a   :  { %v1237_v34 = vadd.f32 1.0, %v1832_v31  ;;  %v1229_v35 = vmul.f32 1.442695, %v1218_v33  ;;  %v1183_v36 = vpop.f32.mrf.mxu2 }
 0x40b   :  { %v1834_v37 = vpop.eup %1833  ;;  %1837 = vrcp.f32 %v1236_v32  ;;  %v1184_v38 = vadd.f32 %v1183_v36, %v812_v28  ;;  %v1196_v39 = vpop.f32.mrf.mxu3 }
 0x40c   :  { %v1836_v40 = vpop.eup %1835  ;;  %v1249_v41 = vmul.f32 %v1834_v37, %v1826_v19  ;;  %1839 = vrcp.f32 %v1237_v34  ;;  %v1197_v42 = vadd.f32 %v1196_v39, %v813_v30  ;;  %v1172_v43 = vpop.f32.mrf.mxu1 }
 0x40d   :  { %v1252_v44 = vmul.f32 %v1836_v40, %v1828_v21  ;;  %1841 = vpow2.f32 %v1229_v35  ;;  %vm1205_vm9 = vcmp.ge.f32.partialorder %v1184_v38, 0.0  ;;  %v1212_v45 = vsub.f32 0.0, %v1184_v38 }
 0x40e   :  { %v1256_v46 = vsel %vm1200_vm4, %v1834_v37, %v1249_v41  ;;  %vm1206_vm10 = vcmp.ge.f32.partialorder %v1197_v42, 0.0  ;;  %v1213_v47 = vsub.f32 0.0, %v1197_v42 }
 0x40f   :  { %1263 = vst [vmem:[#allocation2] sm:$0xff] %v1256_v46  ;;  %v1259_v48 = vsel %vm1203_vm5, %v1836_v40, %v1252_v44  ;;  %v1219_v49 = vsel %vm1205_vm9, %v1212_v45, %v1184_v38 }
 0x410   :  { %1266 = vst [vmem:[#allocation2 + $0x18] sm:$0xff] %v1259_v48  ;;  %v1231_v50 = vmul.f32 1.442695, %v1219_v49  ;;  %v1220_v51 = vsel %vm1206_vm10, %v1213_v47, %v1197_v42 }
 0x411   :  { %v1838_v52 = vpop.eup %1837  ;;  %v1233_v53 = vmul.f32 1.442695, %v1220_v51 }
 0x412   :  { %v1840_v54 = vpop.eup %1839  ;;  %v1250_v55 = vmul.f32 %v1838_v52, %v1830_v29  ;;  %1843 = vpow2.f32 %v1231_v50  ;;  %v1185_v56 = vpop.f32.mrf.mxu2 }
 0x413   :  { %v1842_v57 = vpop.eup %1841  ;;  %v1251_v58 = vmul.f32 %v1840_v54, %v1832_v31  ;;  %1845 = vpow2.f32 %v1233_v53  ;;  %v1198_v59 = vpop.f32.mrf.mxu3 }
 0x414   :  { %v1257_v60 = vsel %vm1201_vm6, %v1838_v52, %v1250_v55  ;;  %v1239_v61 = vadd.f32 1.0, %v1842_v57 }
 0x415   :  { %1264 = vst [vmem:[#allocation2 + $0x8] sm:$0xff] %v1257_v60  ;;  %v1258_v62 = vsel %vm1202_vm7, %v1840_v54, %v1251_v58 }
 0x416   :  { %1265 = vst [vmem:[#allocation2 + $0x10] sm:$0xff] %v1258_v62  ;;  %1847 = vrcp.f32 %v1239_v61 }
 0x418   :  { %v1844_v63 = vpop.eup %1843 }
 0x419   :  { %v1846_v0 = vpop.eup %1845  ;;  %v1240_v1 = vadd.f32 1.0, %v1844_v63 }
 0x41a   :  { %v1241_v2 = vadd.f32 1.0, %v1846_v0 }
 0x41b   :  { %1849 = vrcp.f32 %v1240_v1 }
 0x41c   :  { %v1848_v3 = vpop.eup %1847  ;;  %1851 = vrcp.f32 %v1241_v2 }
 0x41d   :  { %v1253_v4 = vmul.f32 %v1848_v3, %v1842_v57 }
 0x41f   :  { %v1260_v5 = vsel %vm1204_vm8, %v1848_v3, %v1253_v4 }
 0x420   :  { %1267 = vst [vmem:[#allocation2 + $0x20] sm:$0xff] %v1260_v5 }
 0x421   :  { %v1850_v6 = vpop.eup %1849 }
 0x422   :  { %v1852_v7 = vpop.eup %1851  ;;  %v1254_v8 = vmul.f32 %v1850_v6, %v1844_v63 }
 0x423   :  { %v1255_v9 = vmul.f32 %v1852_v7, %v1846_v0 }
 0x424   :  { %v1261_v10 = vsel %vm1205_vm9, %v1850_v6, %v1254_v8 }
 0x425   :  { %1268 = vst [vmem:[#allocation2 + $0x28] sm:$0xff] %v1261_v10  ;;  %v1262_v11 = vsel %vm1206_vm10, %v1852_v7, %v1255_v9 }
 0x426   :  { %1269 = vst.msk [vmem:[#allocation2 + $0x30] sm:$0xff] %vm462_vm0, %v1262_v11 }
 0x427   :  { %1280 = dma.vmem_to_hbm [thread:$0]  %s1276_s14, 896, %s1278_s20, [#allocation3]  }
 0x428   :  { %1877 = dma.done.wait [#allocation3], 896  }
 0x429   :  { %1878 = vsyncadd [#allocation3], 4294966400 }
 0x42a   :  { %1285 = vsyncpa [#allocation3], 1 }

</bundles_post_ra>
